<compile_context>
chip_gen: v6e
topology: v6e:2x2x1
jax: 0.10.0
libtpu: 0.0.40
codegen_flags: <defaults>
</compile_context>

<pallas_src>
import math

import jax
import jax.numpy as jnp
import numpy as np
from jax import lax
from jax.experimental import pallas as pl
from jax.experimental.pallas import tpu as pltpu


def make_fused_kernel(H, W, C, Cout, K, p, depth, padf):
    """Fused forward: both depthwise+pointwise steps + final input residual."""
    HW = H * W
    KK = K * K

    def kernel(x_ref, dww_ref, dwb_ref, pww_ref, pwb_ref, out_ref, zpad_ref):
        # zpad_ref: (C, padf + HW + padf) f32 scratch. Zero halo, store interior.
        zpad_ref[...] = jnp.zeros_like(zpad_ref)
        x0 = x_ref[0].astype(jnp.float32)                 # (C, HW) lane-dense
        zpad_ref[:, padf:padf + HW] = x0

        # Column-validity masks for horizontal taps (depend only on lane position).
        w_idx = lax.broadcasted_iota(jnp.int32, (C, HW), 1) % W
        col_ok = {dwo: jnp.logical_and(w_idx + dwo >= 0, w_idx + dwo < W)
                  for dwo in range(-p, K - p)}

        act = x0
        for d in range(depth):
            wk = dww_ref[d].astype(jnp.float32)           # (C, KK)
            # Initialize accumulator with the depthwise bias (hoisted broadcast).
            acc = jnp.broadcast_to(dwb_ref[d].astype(jnp.float32), (C, HW))
            for kw in range(K):
                dwo = kw - p
                part = jnp.zeros((C, HW), jnp.float32)
                for kh in range(K):
                    off = padf + (kh - p) * W + dwo       # static lane offset
                    tap = zpad_ref[:, off:off + HW]       # ref-sliced load per tap
                    t = kh * K + kw
                    part = part + tap * wk[:, t:t + 1]    # per-channel scale (lane bcast)
                if dwo != 0:
                    # mask row-wrap columns; vertical OOB already zero via the halo
                    part = jnp.where(col_ok[dwo], part, 0.0)
                acc = acc + part

            z = act + acc                                 # x + depthwise(x)

            # 1x1 conv: (Cout, C) @ (C, HW) keeps HW on the lane-dense MXU N dim.
            pw = pww_ref[d].astype(jnp.float32)
            y = jnp.dot(pw, z, preferred_element_type=jnp.float32)
            y = y + pwb_ref[d].astype(jnp.float32)        # (Cout, 1) bias, fused

            if d != depth - 1:
                y = jnp.maximum(y, 0.0)                   # ReLU (all but last step)
                zpad_ref[:, padf:padf + HW] = y           # intermediate stays in VMEM
                act = y
            else:
                out_ref[0] = (x0 + y).astype(out_ref.dtype)   # final "input + x"

    return kernel


def self_residual_dsc_resblock(x_nchw, params, *, padding, stride=1):
    """Full module forward. x_nchw: (N, C, H, W) float32 (PyTorch layout)."""
    assert stride == 1, "residual adds require matching spatial sizes"
    N, C, H, W = x_nchw.shape
    depth = len(params["dw_w"])
    K = params["dw_w"][0].shape[-1]
    Cout = params["pw_w"][0].shape[0]
    assert Cout == C, "module structure requires out_channels == in_channels"
    assert 2 * padding == K - 1, "spatial size must be preserved"
    HW = H * W

    # Stack per-depth weights into single arrays (tiny; loaded once into VMEM).
    dww = jnp.stack([w.reshape(C, K * K) for w in params["dw_w"]])      # (D, C, KK)
    dwb = jnp.stack([b.reshape(C, 1) for b in params["dw_b"]])          # (D, C, 1)
    pww = jnp.stack(params["pw_w"])                                     # (D, Cout, C)
    pwb = jnp.stack([b.reshape(Cout, 1) for b in params["pw_b"]])       # (D, Cout, 1)

    # Flatten H*W onto the lane axis (free, contiguous reshape — no transpose).
    x_flat = x_nchw.reshape(N, C, HW)

    # Flat halo size: must cover |(kh-p)*W + (kw-p)| <= p*(W+1); round to 128 lanes
    # so the interior sits lane-aligned.
    need = padding * (W + 1)
    padf = ((need + 127) // 128) * 128 if need > 0 else 0

    kernel = make_fused_kernel(H, W, C, Cout, K, padding, depth, padf)

    out_flat = pl.pallas_call(
        kernel,
        out_shape=jax.ShapeDtypeStruct((N, Cout, HW), x_nchw.dtype),
        grid=(N,),
        in_specs=[
            pl.BlockSpec((1, C, HW), lambda n: (n, 0, 0)),
            pl.BlockSpec((depth, C, K * K), lambda n: (0, 0, 0)),
            pl.BlockSpec((depth, C, 1), lambda n: (0, 0, 0)),
            pl.BlockSpec((depth, Cout, C), lambda n: (0, 0, 0)),
            pl.BlockSpec((depth, Cout, 1), lambda n: (0, 0, 0)),
        ],
        out_specs=pl.BlockSpec((1, Cout, HW), lambda n: (n, 0, 0)),
        scratch_shapes=[pltpu.VMEM((C, HW + 2 * padf), jnp.float32)],
        compiler_params=pltpu.CompilerParams(
            dimension_semantics=("parallel",),
            vmem_limit_bytes=48 * 1024 * 1024,   # explicit; working set here is ~KBs
        ),
    )(x_flat, dww, dwb, pww, pwb)

    return out_flat.reshape(N, Cout, H, W)


def init_params(key, C, Cout, K, depth=2):
    """Deterministic init mimicking PyTorch Conv2d default (uniform +-1/sqrt(fan_in))."""
    params = {"dw_w": [], "dw_b": [], "pw_w": [], "pw_b": []}
    for _ in range(depth):
        key, k1, k2, k3, k4 = jax.random.split(key, 5)
        b_dw = 1.0 / math.sqrt(K * K)          # depthwise fan_in per group = 1*K*K
        params["dw_w"].append(jax.random.uniform(k1, (C, K, K), jnp.float32, -b_dw, b_dw))
        params["dw_b"].append(jax.random.uniform(k2, (C,), jnp.float32, -b_dw, b_dw))
        b_pw = 1.0 / math.sqrt(C)              # pointwise fan_in = C*1*1
        params["pw_w"].append(jax.random.uniform(k3, (Cout, C), jnp.float32, -b_pw, b_pw))
        params["pw_b"].append(jax.random.uniform(k4, (Cout,), jnp.float32, -b_pw, b_pw))
    return params


def reference(x_nchw, params, *, padding):
    """Pure-JAX reference (lax.conv) reproducing the PyTorch forward exactly."""
    x = x_nchw
    inp = x
    C = x.shape[1]
    depth = len(params["dw_w"])
    for d in range(depth):
        w_dw = params["dw_w"][d][:, None, :, :]                    # (C, 1, K, K)
        y = lax.conv_general_dilated(
            x, w_dw, (1, 1), [(padding, padding)] * 2, feature_group_count=C)
        y = y + params["dw_b"][d][None, :, None, None]
        z = x + y
        w_pw = params["pw_w"][d][:, :, None, None]                 # (Cout, C, 1, 1)
        p = lax.conv_general_dilated(z, w_pw, (1, 1), [(0, 0), (0, 0)])
        p = p + params["pw_b"][d][None, :, None, None]
        if d != depth - 1:
            p = jnp.maximum(p, 0.0)
        x = p
    return inp + x


if __name__ == "__main__":
    N, C, H, W = 2, 4, 16, 16
    K, stride, padding = 3, 1, 1  # stride must be 1 (residual semantics)

    key = jax.random.PRNGKey(0)
    kx, kp = jax.random.split(key)
    x = jax.random.normal(kx, (N, C, H, W), jnp.float32)
    params = init_params(kp, C, C, K, depth=2)

    out = self_residual_dsc_resblock(x, params, padding=padding)
    out = jax.block_until_ready(out)

    ref = reference(x, params, padding=padding)
    np.testing.assert_allclose(np.asarray(out), np.asarray(ref), rtol=1e-5, atol=1e-5)

    print("KERNEL_OK")
</pallas_src>

<mosaic_0001>
module attributes {stable_mosaic.version = 11 : i64} {
  func.func @kernel(%arg0: i32, %arg1: memref<1x4x256xf32, #tpu.memory_space<vmem>>, %arg2: memref<2x4x9xf32, #tpu.memory_space<vmem>>, %arg3: memref<2x4x1xf32, #tpu.memory_space<vmem>>, %arg4: memref<2x4x4xf32, #tpu.memory_space<vmem>>, %arg5: memref<2x4x1xf32, #tpu.memory_space<vmem>>, %arg6: memref<1x4x256xf32, #tpu.memory_space<vmem>>, %arg7: memref<4x512xf32, #tpu.memory_space<vmem>>) attributes {dimension_semantics = [#tpu.dimension_semantics<parallel>], iteration_bounds = array<i64: 2>, scalar_prefetch = 0 : i64, scratch_operands = 1 : i64, tpu.core_type = #tpu.core_type<tc>, window_params = [{transform_indices = @transform_0, window_bounds = array<i64: 1, 4, 256>}, {pipeline_mode = #tpu.pipeline_mode<synchronous>, transform_indices = @transform_1, window_bounds = array<i64: 2, 4, 9>}, {pipeline_mode = #tpu.pipeline_mode<synchronous>, transform_indices = @transform_2, window_bounds = array<i64: 2, 4, 1>}, {pipeline_mode = #tpu.pipeline_mode<synchronous>, transform_indices = @transform_3, window_bounds = array<i64: 2, 4, 4>}, {pipeline_mode = #tpu.pipeline_mode<synchronous>, transform_indices = @transform_4, window_bounds = array<i64: 2, 4, 1>}, {transform_indices = @transform_5, window_bounds = array<i64: 1, 4, 256>}]} {
    %cst = arith.constant 0.000000e+00 : f32
    %0 = vector.broadcast %cst : f32 to vector<4x512xf32>
    %c0 = arith.constant 0 : index
    %c0_0 = arith.constant 0 : index
    %1 = vector.load %arg7[%c0, %c0_0] : memref<4x512xf32, #tpu.memory_space<vmem>>, vector<4x512xf32>
    tpu.vector_store %arg7[%c0, %c0_0], %0 {strides = array<i32>} : memref<4x512xf32, #tpu.memory_space<vmem>>, vector<4x512xf32>,
    %c0_1 = arith.constant 0 : index
    %c0_2 = arith.constant 0 : index
    %c0_3 = arith.constant 0 : index
    %2 = vector.load %arg1[%c0_1, %c0_2, %c0_3] : memref<1x4x256xf32, #tpu.memory_space<vmem>>, vector<1x4x256xf32>
    %3 = vector.shape_cast %2 : vector<1x4x256xf32> to vector<4x256xf32>
    %c0_4 = arith.constant 0 : index
    %c128 = arith.constant 128 : index
    %4 = vector.load %arg7[%c0_4, %c128] : memref<4x512xf32, #tpu.memory_space<vmem>>, vector<4x256xf32>
    tpu.vector_store %arg7[%c0_4, %c128], %3 {strides = array<i32>} : memref<4x512xf32, #tpu.memory_space<vmem>>, vector<4x256xf32>,
    %5 = tpu.iota {dimensions = array<i32: 1>} : vector<4x256xi32>
    %c16_i32 = arith.constant 16 : i32
    %c0_i32 = arith.constant 0 : i32
    %6 = arith.cmpi eq, %c16_i32, %c0_i32 : i32
    %c1_i32 = arith.constant 1 : i32
    %7 = arith.select %6, %c1_i32, %c16_i32 : i32
    %8 = vector.broadcast %7 : i32 to vector<4x256xi32>
    %9 = arith.remsi %5, %8 : vector<4x256xi32>
    %c0_i32_5 = arith.constant 0 : i32
    %10 = vector.broadcast %c0_i32_5 : i32 to vector<4x256xi32>
    %11 = arith.cmpi ne, %9, %10 : vector<4x256xi32>
    %c0_i32_6 = arith.constant 0 : i32
    %12 = vector.broadcast %c0_i32_6 : i32 to vector<4x256xi32>
    %13 = arith.cmpi slt, %9, %12 : vector<4x256xi32>
    %c0_i32_7 = arith.constant 0 : i32
    %14 = arith.cmpi slt, %7, %c0_i32_7 : i32
    %15 = vector.broadcast %14 : i1 to vector<4x256xi1>
    %16 = vector.broadcast %15 : vector<4x256xi1> to vector<4x256xi1>
    %17 = arith.xori %13, %16 : vector<4x256xi1>
    %18 = arith.andi %17, %11 : vector<4x256xi1>
    %19 = vector.broadcast %7 : i32 to vector<4x256xi32>
    %20 = arith.addi %9, %19 : vector<4x256xi32>
    %21 = arith.select %18, %20, %9 : vector<4x256xi1>, vector<4x256xi32>
    %c-1_i32 = arith.constant -1 : i32
    %22 = vector.broadcast %c-1_i32 : i32 to vector<4x256xi32>
    %23 = arith.addi %21, %22 : vector<4x256xi32>
    %c0_i32_8 = arith.constant 0 : i32
    %24 = vector.broadcast %c0_i32_8 : i32 to vector<4x256xi32>
    %25 = arith.cmpi sge, %23, %24 : vector<4x256xi32>
    %c-1_i32_9 = arith.constant -1 : i32
    %26 = vector.broadcast %c-1_i32_9 : i32 to vector<4x256xi32>
    %27 = arith.addi %21, %26 : vector<4x256xi32>
    %c16_i32_10 = arith.constant 16 : i32
    %28 = vector.broadcast %c16_i32_10 : i32 to vector<4x256xi32>
    %29 = arith.cmpi slt, %27, %28 : vector<4x256xi32>
    %30 = arith.andi %25, %29 : vector<4x256xi1>
    %c1_i32_11 = arith.constant 1 : i32
    %31 = vector.broadcast %c1_i32_11 : i32 to vector<4x256xi32>
    %32 = arith.addi %21, %31 : vector<4x256xi32>
    %c0_i32_12 = arith.constant 0 : i32
    %33 = vector.broadcast %c0_i32_12 : i32 to vector<4x256xi32>
    %34 = arith.cmpi sge, %32, %33 : vector<4x256xi32>
    %c1_i32_13 = arith.constant 1 : i32
    %35 = vector.broadcast %c1_i32_13 : i32 to vector<4x256xi32>
    %36 = arith.addi %21, %35 : vector<4x256xi32>
    %c16_i32_14 = arith.constant 16 : i32
    %37 = vector.broadcast %c16_i32_14 : i32 to vector<4x256xi32>
    %38 = arith.cmpi slt, %36, %37 : vector<4x256xi32>
    %39 = arith.andi %34, %38 : vector<4x256xi1>
    %c0_15 = arith.constant 0 : index
    %c0_16 = arith.constant 0 : index
    %c0_17 = arith.constant 0 : index
    %40 = vector.load %arg2[%c0_15, %c0_16, %c0_17] : memref<2x4x9xf32, #tpu.memory_space<vmem>>, vector<1x4x9xf32>
    %41 = vector.shape_cast %40 : vector<1x4x9xf32> to vector<4x9xf32>
    %c0_18 = arith.constant 0 : index
    %c0_19 = arith.constant 0 : index
    %c0_20 = arith.constant 0 : index
    %42 = vector.load %arg3[%c0_18, %c0_19, %c0_20] : memref<2x4x1xf32, #tpu.memory_space<vmem>>, vector<1x4x1xf32>
    %43 = vector.shape_cast %42 : vector<1x4x1xf32> to vector<4x1xf32>
    %44 = vector.shape_cast %43 : vector<4x1xf32> to vector<4x1xf32>
    %45 = vector.broadcast %44 : vector<4x1xf32> to vector<4x256xf32>
    %cst_21 = arith.constant 0.000000e+00 : f32
    %46 = vector.broadcast %cst_21 : f32 to vector<4x256xf32>
    %c0_22 = arith.constant 0 : index
    %c111 = arith.constant 111 : index
    %47 = vector.load %arg7[%c0_22, %c111] : memref<4x512xf32, #tpu.memory_space<vmem>>, vector<4x256xf32>
    %48 = vector.extract_strided_slice %41 {offsets = [0, 0], sizes = [4, 1], strides = [1, 1]} : vector<4x9xf32> to vector<4x1xf32>
    %49 = vector.broadcast %48 : vector<4x1xf32> to vector<4x256xf32>
    %50 = arith.mulf %47, %49 : vector<4x256xf32>
    %51 = arith.addf %46, %50 : vector<4x256xf32>
    %c0_23 = arith.constant 0 : index
    %c127 = arith.constant 127 : index
    %52 = vector.load %arg7[%c0_23, %c127] : memref<4x512xf32, #tpu.memory_space<vmem>>, vector<4x256xf32>
    %53 = vector.extract_strided_slice %41 {offsets = [0, 3], sizes = [4, 1], strides = [1, 1]} : vector<4x9xf32> to vector<4x1xf32>
    %54 = vector.broadcast %53 : vector<4x1xf32> to vector<4x256xf32>
    %55 = arith.mulf %52, %54 : vector<4x256xf32>
    %56 = arith.addf %51, %55 : vector<4x256xf32>
    %c0_24 = arith.constant 0 : index
    %c143 = arith.constant 143 : index
    %57 = vector.load %arg7[%c0_24, %c143] : memref<4x512xf32, #tpu.memory_space<vmem>>, vector<4x256xf32>
    %58 = vector.extract_strided_slice %41 {offsets = [0, 6], sizes = [4, 1], strides = [1, 1]} : vector<4x9xf32> to vector<4x1xf32>
    %59 = vector.broadcast %58 : vector<4x1xf32> to vector<4x256xf32>
    %60 = arith.mulf %57, %59 : vector<4x256xf32>
    %61 = arith.addf %56, %60 : vector<4x256xf32>
    %cst_25 = arith.constant 0.000000e+00 : f32
    %62 = vector.broadcast %cst_25 : f32 to vector<4x256xf32>
    %63 = arith.select %30, %61, %62 : vector<4x256xi1>, vector<4x256xf32>
    %64 = arith.addf %45, %63 : vector<4x256xf32>
    %cst_26 = arith.constant 0.000000e+00 : f32
    %65 = vector.broadcast %cst_26 : f32 to vector<4x256xf32>
    %c0_27 = arith.constant 0 : index
    %c112 = arith.constant 112 : index
    %66 = vector.load %arg7[%c0_27, %c112] : memref<4x512xf32, #tpu.memory_space<vmem>>, vector<4x256xf32>
    %67 = vector.extract_strided_slice %41 {offsets = [0, 1], sizes = [4, 1], strides = [1, 1]} : vector<4x9xf32> to vector<4x1xf32>
    %68 = vector.broadcast %67 : vector<4x1xf32> to vector<4x256xf32>
    %69 = arith.mulf %66, %68 : vector<4x256xf32>
    %70 = arith.addf %65, %69 : vector<4x256xf32>
    %c0_28 = arith.constant 0 : index
    %c128_29 = arith.constant 128 : index
    %71 = vector.load %arg7[%c0_28, %c128_29] : memref<4x512xf32, #tpu.memory_space<vmem>>, vector<4x256xf32>
    %72 = vector.extract_strided_slice %41 {offsets = [0, 4], sizes = [4, 1], strides = [1, 1]} : vector<4x9xf32> to vector<4x1xf32>
    %73 = vector.broadcast %72 : vector<4x1xf32> to vector<4x256xf32>
    %74 = arith.mulf %71, %73 : vector<4x256xf32>
    %75 = arith.addf %70, %74 : vector<4x256xf32>
    %c0_30 = arith.constant 0 : index
    %c144 = arith.constant 144 : index
    %76 = vector.load %arg7[%c0_30, %c144] : memref<4x512xf32, #tpu.memory_space<vmem>>, vector<4x256xf32>
    %77 = vector.extract_strided_slice %41 {offsets = [0, 7], sizes = [4, 1], strides = [1, 1]} : vector<4x9xf32> to vector<4x1xf32>
    %78 = vector.broadcast %77 : vector<4x1xf32> to vector<4x256xf32>
    %79 = arith.mulf %76, %78 : vector<4x256xf32>
    %80 = arith.addf %75, %79 : vector<4x256xf32>
    %81 = arith.addf %64, %80 : vector<4x256xf32>
    %cst_31 = arith.constant 0.000000e+00 : f32
    %82 = vector.broadcast %cst_31 : f32 to vector<4x256xf32>
    %c0_32 = arith.constant 0 : index
    %c113 = arith.constant 113 : index
    %83 = vector.load %arg7[%c0_32, %c113] : memref<4x512xf32, #tpu.memory_space<vmem>>, vector<4x256xf32>
    %84 = vector.extract_strided_slice %41 {offsets = [0, 2], sizes = [4, 1], strides = [1, 1]} : vector<4x9xf32> to vector<4x1xf32>
    %85 = vector.broadcast %84 : vector<4x1xf32> to vector<4x256xf32>
    %86 = arith.mulf %83, %85 : vector<4x256xf32>
    %87 = arith.addf %82, %86 : vector<4x256xf32>
    %c0_33 = arith.constant 0 : index
    %c129 = arith.constant 129 : index
    %88 = vector.load %arg7[%c0_33, %c129] : memref<4x512xf32, #tpu.memory_space<vmem>>, vector<4x256xf32>
    %89 = vector.extract_strided_slice %41 {offsets = [0, 5], sizes = [4, 1], strides = [1, 1]} : vector<4x9xf32> to vector<4x1xf32>
    %90 = vector.broadcast %89 : vector<4x1xf32> to vector<4x256xf32>
    %91 = arith.mulf %88, %90 : vector<4x256xf32>
    %92 = arith.addf %87, %91 : vector<4x256xf32>
    %c0_34 = arith.constant 0 : index
    %c145 = arith.constant 145 : index
    %93 = vector.load %arg7[%c0_34, %c145] : memref<4x512xf32, #tpu.memory_space<vmem>>, vector<4x256xf32>
    %94 = vector.extract_strided_slice %41 {offsets = [0, 8], sizes = [4, 1], strides = [1, 1]} : vector<4x9xf32> to vector<4x1xf32>
    %95 = vector.broadcast %94 : vector<4x1xf32> to vector<4x256xf32>
    %96 = arith.mulf %93, %95 : vector<4x256xf32>
    %97 = arith.addf %92, %96 : vector<4x256xf32>
    %cst_35 = arith.constant 0.000000e+00 : f32
    %98 = vector.broadcast %cst_35 : f32 to vector<4x256xf32>
    %99 = arith.select %39, %97, %98 : vector<4x256xi1>, vector<4x256xf32>
    %100 = arith.addf %81, %99 : vector<4x256xf32>
    %101 = arith.addf %3, %100 : vector<4x256xf32>
    %c0_36 = arith.constant 0 : index
    %c0_37 = arith.constant 0 : index
    %c0_38 = arith.constant 0 : index
    %102 = vector.load %arg4[%c0_36, %c0_37, %c0_38] : memref<2x4x4xf32, #tpu.memory_space<vmem>>, vector<1x4x4xf32>
    %103 = vector.shape_cast %102 : vector<1x4x4xf32> to vector<4x4xf32>
    %cst_39 = arith.constant dense<0.000000e+00> : vector<4x256xf32>
    %104 = tpu.matmul %103, %101, %cst_39 {dimension_numbers = #tpu.dot_dimension_numbers<[1], [0], [0], [1], [0, 0, 1, 1], [], []>} : vector<4x4xf32>, vector<4x256xf32>, vector<4x256xf32> -> vector<4x256xf32>
    %c0_40 = arith.constant 0 : index
    %c0_41 = arith.constant 0 : index
    %c0_42 = arith.constant 0 : index
    %105 = vector.load %arg5[%c0_40, %c0_41, %c0_42] : memref<2x4x1xf32, #tpu.memory_space<vmem>>, vector<1x4x1xf32>
    %106 = vector.shape_cast %105 : vector<1x4x1xf32> to vector<4x1xf32>
    %107 = vector.broadcast %106 : vector<4x1xf32> to vector<4x256xf32>
    %108 = arith.addf %104, %107 : vector<4x256xf32>
    %cst_43 = arith.constant 0.000000e+00 : f32
    %109 = vector.broadcast %cst_43 : f32 to vector<4x256xf32>
    %110 = arith.maximumf %108, %109 : vector<4x256xf32>
    %c0_44 = arith.constant 0 : index
    %c128_45 = arith.constant 128 : index
    %111 = vector.load %arg7[%c0_44, %c128_45] : memref<4x512xf32, #tpu.memory_space<vmem>>, vector<4x256xf32>
    tpu.vector_store %arg7[%c0_44, %c128_45], %110 {strides = array<i32>} : memref<4x512xf32, #tpu.memory_space<vmem>>, vector<4x256xf32>,
    %c1 = arith.constant 1 : index
    %c0_46 = arith.constant 0 : index
    %c0_47 = arith.constant 0 : index
    %112 = vector.load %arg2[%c1, %c0_46, %c0_47] : memref<2x4x9xf32, #tpu.memory_space<vmem>>, vector<1x4x9xf32>
    %113 = vector.shape_cast %112 : vector<1x4x9xf32> to vector<4x9xf32>
    %c1_48 = arith.constant 1 : index
    %c0_49 = arith.constant 0 : index
    %c0_50 = arith.constant 0 : index
    %114 = vector.load %arg3[%c1_48, %c0_49, %c0_50] : memref<2x4x1xf32, #tpu.memory_space<vmem>>, vector<1x4x1xf32>
    %115 = vector.shape_cast %114 : vector<1x4x1xf32> to vector<4x1xf32>
    %116 = vector.shape_cast %115 : vector<4x1xf32> to vector<4x1xf32>
    %117 = vector.broadcast %116 : vector<4x1xf32> to vector<4x256xf32>
    %cst_51 = arith.constant 0.000000e+00 : f32
    %118 = vector.broadcast %cst_51 : f32 to vector<4x256xf32>
    %c0_52 = arith.constant 0 : index
    %c111_53 = arith.constant 111 : index
    %119 = vector.load %arg7[%c0_52, %c111_53] : memref<4x512xf32, #tpu.memory_space<vmem>>, vector<4x256xf32>
    %120 = vector.extract_strided_slice %113 {offsets = [0, 0], sizes = [4, 1], strides = [1, 1]} : vector<4x9xf32> to vector<4x1xf32>
    %121 = vector.broadcast %120 : vector<4x1xf32> to vector<4x256xf32>
    %122 = arith.mulf %119, %121 : vector<4x256xf32>
    %123 = arith.addf %118, %122 : vector<4x256xf32>
    %c0_54 = arith.constant 0 : index
    %c127_55 = arith.constant 127 : index
    %124 = vector.load %arg7[%c0_54, %c127_55] : memref<4x512xf32, #tpu.memory_space<vmem>>, vector<4x256xf32>
    %125 = vector.extract_strided_slice %113 {offsets = [0, 3], sizes = [4, 1], strides = [1, 1]} : vector<4x9xf32> to vector<4x1xf32>
    %126 = vector.broadcast %125 : vector<4x1xf32> to vector<4x256xf32>
    %127 = arith.mulf %124, %126 : vector<4x256xf32>
    %128 = arith.addf %123, %127 : vector<4x256xf32>
    %c0_56 = arith.constant 0 : index
    %c143_57 = arith.constant 143 : index
    %129 = vector.load %arg7[%c0_56, %c143_57] : memref<4x512xf32, #tpu.memory_space<vmem>>, vector<4x256xf32>
    %130 = vector.extract_strided_slice %113 {offsets = [0, 6], sizes = [4, 1], strides = [1, 1]} : vector<4x9xf32> to vector<4x1xf32>
    %131 = vector.broadcast %130 : vector<4x1xf32> to vector<4x256xf32>
    %132 = arith.mulf %129, %131 : vector<4x256xf32>
    %133 = arith.addf %128, %132 : vector<4x256xf32>
    %cst_58 = arith.constant 0.000000e+00 : f32
    %134 = vector.broadcast %cst_58 : f32 to vector<4x256xf32>
    %135 = arith.select %30, %133, %134 : vector<4x256xi1>, vector<4x256xf32>
    %136 = arith.addf %117, %135 : vector<4x256xf32>
    %cst_59 = arith.constant 0.000000e+00 : f32
    %137 = vector.broadcast %cst_59 : f32 to vector<4x256xf32>
    %c0_60 = arith.constant 0 : index
    %c112_61 = arith.constant 112 : index
    %138 = vector.load %arg7[%c0_60, %c112_61] : memref<4x512xf32, #tpu.memory_space<vmem>>, vector<4x256xf32>
    %139 = vector.extract_strided_slice %113 {offsets = [0, 1], sizes = [4, 1], strides = [1, 1]} : vector<4x9xf32> to vector<4x1xf32>
    %140 = vector.broadcast %139 : vector<4x1xf32> to vector<4x256xf32>
    %141 = arith.mulf %138, %140 : vector<4x256xf32>
    %142 = arith.addf %137, %141 : vector<4x256xf32>
    %c0_62 = arith.constant 0 : index
    %c128_63 = arith.constant 128 : index
    %143 = vector.load %arg7[%c0_62, %c128_63] : memref<4x512xf32, #tpu.memory_space<vmem>>, vector<4x256xf32>
    %144 = vector.extract_strided_slice %113 {offsets = [0, 4], sizes = [4, 1], strides = [1, 1]} : vector<4x9xf32> to vector<4x1xf32>
    %145 = vector.broadcast %144 : vector<4x1xf32> to vector<4x256xf32>
    %146 = arith.mulf %143, %145 : vector<4x256xf32>
    %147 = arith.addf %142, %146 : vector<4x256xf32>
    %c0_64 = arith.constant 0 : index
    %c144_65 = arith.constant 144 : index
    %148 = vector.load %arg7[%c0_64, %c144_65] : memref<4x512xf32, #tpu.memory_space<vmem>>, vector<4x256xf32>
    %149 = vector.extract_strided_slice %113 {offsets = [0, 7], sizes = [4, 1], strides = [1, 1]} : vector<4x9xf32> to vector<4x1xf32>
    %150 = vector.broadcast %149 : vector<4x1xf32> to vector<4x256xf32>
    %151 = arith.mulf %148, %150 : vector<4x256xf32>
    %152 = arith.addf %147, %151 : vector<4x256xf32>
    %153 = arith.addf %136, %152 : vector<4x256xf32>
    %cst_66 = arith.constant 0.000000e+00 : f32
    %154 = vector.broadcast %cst_66 : f32 to vector<4x256xf32>
    %c0_67 = arith.constant 0 : index
    %c113_68 = arith.constant 113 : index
    %155 = vector.load %arg7[%c0_67, %c113_68] : memref<4x512xf32, #tpu.memory_space<vmem>>, vector<4x256xf32>
    %156 = vector.extract_strided_slice %113 {offsets = [0, 2], sizes = [4, 1], strides = [1, 1]} : vector<4x9xf32> to vector<4x1xf32>
    %157 = vector.broadcast %156 : vector<4x1xf32> to vector<4x256xf32>
    %158 = arith.mulf %155, %157 : vector<4x256xf32>
    %159 = arith.addf %154, %158 : vector<4x256xf32>
    %c0_69 = arith.constant 0 : index
    %c129_70 = arith.constant 129 : index
    %160 = vector.load %arg7[%c0_69, %c129_70] : memref<4x512xf32, #tpu.memory_space<vmem>>, vector<4x256xf32>
    %161 = vector.extract_strided_slice %113 {offsets = [0, 5], sizes = [4, 1], strides = [1, 1]} : vector<4x9xf32> to vector<4x1xf32>
    %162 = vector.broadcast %161 : vector<4x1xf32> to vector<4x256xf32>
    %163 = arith.mulf %160, %162 : vector<4x256xf32>
    %164 = arith.addf %159, %163 : vector<4x256xf32>
    %c0_71 = arith.constant 0 : index
    %c145_72 = arith.constant 145 : index
    %165 = vector.load %arg7[%c0_71, %c145_72] : memref<4x512xf32, #tpu.memory_space<vmem>>, vector<4x256xf32>
    %166 = vector.extract_strided_slice %113 {offsets = [0, 8], sizes = [4, 1], strides = [1, 1]} : vector<4x9xf32> to vector<4x1xf32>
    %167 = vector.broadcast %166 : vector<4x1xf32> to vector<4x256xf32>
    %168 = arith.mulf %165, %167 : vector<4x256xf32>
    %169 = arith.addf %164, %168 : vector<4x256xf32>
    %cst_73 = arith.constant 0.000000e+00 : f32
    %170 = vector.broadcast %cst_73 : f32 to vector<4x256xf32>
    %171 = arith.select %39, %169, %170 : vector<4x256xi1>, vector<4x256xf32>
    %172 = arith.addf %153, %171 : vector<4x256xf32>
    %173 = arith.addf %110, %172 : vector<4x256xf32>
    %c1_74 = arith.constant 1 : index
    %c0_75 = arith.constant 0 : index
    %c0_76 = arith.constant 0 : index
    %174 = vector.load %arg4[%c1_74, %c0_75, %c0_76] : memref<2x4x4xf32, #tpu.memory_space<vmem>>, vector<1x4x4xf32>
    %175 = vector.shape_cast %174 : vector<1x4x4xf32> to vector<4x4xf32>
    %cst_77 = arith.constant dense<0.000000e+00> : vector<4x256xf32>
    %176 = tpu.matmul %175, %173, %cst_77 {dimension_numbers = #tpu.dot_dimension_numbers<[1], [0], [0], [1], [0, 0, 1, 1], [], []>} : vector<4x4xf32>, vector<4x256xf32>, vector<4x256xf32> -> vector<4x256xf32>
    %c1_78 = arith.constant 1 : index
    %c0_79 = arith.constant 0 : index
    %c0_80 = arith.constant 0 : index
    %177 = vector.load %arg5[%c1_78, %c0_79, %c0_80] : memref<2x4x1xf32, #tpu.memory_space<vmem>>, vector<1x4x1xf32>
    %178 = vector.shape_cast %177 : vector<1x4x1xf32> to vector<4x1xf32>
    %179 = vector.broadcast %178 : vector<4x1xf32> to vector<4x256xf32>
    %180 = arith.addf %176, %179 : vector<4x256xf32>
    %181 = arith.addf %3, %180 : vector<4x256xf32>
    %c0_81 = arith.constant 0 : index
    %c0_82 = arith.constant 0 : index
    %c0_83 = arith.constant 0 : index
    %182 = vector.load %arg6[%c0_81, %c0_82, %c0_83] : memref<1x4x256xf32, #tpu.memory_space<vmem>>, vector<1x4x256xf32>
    %183 = vector.shape_cast %182 : vector<1x4x256xf32> to vector<4x256xf32>
    %184 = vector.shape_cast %181 : vector<4x256xf32> to vector<1x4x256xf32>
    tpu.vector_store %arg6[%c0_81, %c0_82, %c0_83], %184 {strides = array<i32>} : memref<1x4x256xf32, #tpu.memory_space<vmem>>, vector<1x4x256xf32>,
    return
  }
  func.func @transform_0(%arg0: i32) -> (i32, i32, i32) {
    %c0_i32 = arith.constant 0 : i32
    %c0_i32_0 = arith.constant 0 : i32
    %c0_i32_1 = arith.constant 0 : i32
    return %arg0, %c0_i32, %c0_i32_0 : i32, i32, i32
  }
  func.func @transform_1(%arg0: i32) -> (i32, i32, i32) {
    %c0_i32 = arith.constant 0 : i32
    %c0_i32_0 = arith.constant 0 : i32
    %c0_i32_1 = arith.constant 0 : i32
    %c0_i32_2 = arith.constant 0 : i32
    return %c0_i32, %c0_i32_0, %c0_i32_1 : i32, i32, i32
  }
  func.func @transform_2(%arg0: i32) -> (i32, i32, i32) {
    %c0_i32 = arith.constant 0 : i32
    %c0_i32_0 = arith.constant 0 : i32
    %c0_i32_1 = arith.constant 0 : i32
    %c0_i32_2 = arith.constant 0 : i32
    return %c0_i32, %c0_i32_0, %c0_i32_1 : i32, i32, i32
  }
  func.func @transform_3(%arg0: i32) -> (i32, i32, i32) {
    %c0_i32 = arith.constant 0 : i32
    %c0_i32_0 = arith.constant 0 : i32
    %c0_i32_1 = arith.constant 0 : i32
    %c0_i32_2 = arith.constant 0 : i32
    return %c0_i32, %c0_i32_0, %c0_i32_1 : i32, i32, i32
  }
  func.func @transform_4(%arg0: i32) -> (i32, i32, i32) {
    %c0_i32 = arith.constant 0 : i32
    %c0_i32_0 = arith.constant 0 : i32
    %c0_i32_1 = arith.constant 0 : i32
    %c0_i32_2 = arith.constant 0 : i32
    return %c0_i32, %c0_i32_0, %c0_i32_1 : i32, i32, i32
  }
  func.func @transform_5(%arg0: i32) -> (i32, i32, i32) {
    %c0_i32 = arith.constant 0 : i32
    %c0_i32_0 = arith.constant 0 : i32
    %c0_i32_1 = arith.constant 0 : i32
    return %arg0, %c0_i32, %c0_i32_0 : i32, i32, i32
  }
}

</mosaic_0001>

<bundles_post_ra>
// kernel: tpu_custom_call.1
= control target key start
LH: loop header
LB: loop body
LE: loop exit
PB: predicated region body
PF: predicated region fallthrough
CT: control target
= control target key end

     0   :  { %10 = vsyncpa [#allocation4], 0  ;;  %s1672_s0 = inlined_call_operand.vmem [shape: f32[2,4,256], index: 0, kind: input, shape index: {}]   ;;  %s1673_s1 = inlined_call_operand.hbm [shape: f32[2,4,9], index: 1, kind: input, shape index: {}]   ;;  %s1674_s2 = inlined_call_operand.vmem [shape: f32[2,4,1], index: 2, kind: input, shape index: {}]   ;;  %s1675_s3 = inlined_call_operand.vmem [shape: f32[2,4,4], index: 3, kind: input, shape index: {}]   ;;  %s1676_s4 = inlined_call_operand.vmem [shape: f32[2,4,1], index: 4, kind: input, shape index: {}]   ;;  %s1677_s5 = inlined_call_operand.hbm [shape: f32[2,4,256], index: 5, kind: output, shape index: {}]  }
   0x1   :  { %11 = vsyncpa [#allocation5], 0 }
   0x2   :  { %13 = vsyncpa [#allocation5 + $0x1], 0  ;;  %s1365_s18 = smov 0   ;;  %s1367_s19 = smov 0  }
   0x3   :  { %s1369_s20 = smov 0   ;;  %s1371_s21 = smov 0  }
   0x4 LB: > { %s1386_s22 = sadd.s32 4294967295, %s1313_s21   ;;  %s1110_s23 = sadd.s32 4294967294, %s1313_s21   ;;  %s1313_s21 = sphi %s1371_s21, %s1685_s21   ;;  %s1309_s20 = sphi %s1369_s20, %s1684_s20   ;;  %s1305_s19 = sphi %s1367_s19, %s1683_s19   ;;  %s1301_s18 = sphi %s1365_s18, %s1682_s18  }
   0x5   : > { %s1390_s24 = sadd.s32 1, %s1313_s21   ;;  %s136_s25 = sadd.s32 1, %s1309_s20 }
   0x6   : > { %s133_s26 = ssub.s32 %s1313_s21, %s1390_s24  ;;  %p146_p0 = scmp.ne.s32.totalorder %s1309_s20, %s1305_s19 }
   0x7   : > { %p134_p1 = scmp.eq.s32.totalorder %s133_s26, 0  ;;  %p147_p2 = scmp.eq.s32.totalorder %s1386_s22, 1 }
   0x8   : > { %p152_p3 = scmp.ne.s32.totalorder %s1305_s19, %s1301_s18  ;;  %p153_p4 = scmp.eq.s32.totalorder %s1110_s23, 1 }
   0x9   : > { %s1401_s27 = scalar_select %p134_p1, %s1309_s20, %s136_s25  }
   0xa   : > { %p1403_p5 = por %p147_p2, %p146_p0  ;;  %p1407_p6 = por %p153_p4, %p152_p3 }
   0xb   : > { %p1111_p7 = scmp.ge.s32.totalorder %s1313_s21, 1  ;;  %p160_p8 = scmp.lt.s32.totalorder %s1313_s21, 3 }
   0xc   : > { %s1679_s29 = scalar_select %p1407_p6, 1, 0 }
   0xd   : > { %p1149_p9 = scmp.eq.s32.totalorder %s1386_s22, 0  ;;  %p1414_p10 = pnand %p1111_p7, %p160_p8 }
   0xe   : > { %s1315_s6 = smov [#allocation3]  }
   0xf   : > { %s172_s7 = sshll.u32 %s1315_s6, 4  ;;  %p1141_p11 = pneg %p1414_p10  ;;  %s173_s7 = int_to_ptr.vmem [resolvable:$true] %s172_s7 }
  0x10   : > { %s1234_s8 = scalar_lea.vmem %s173_s7, 128  ;;  %p1242_p3 = scmp.lt.s32.totalorder %s173_s7, %s173_s7 }
  0x11   : > { %p1142_p12 = pnand %p1149_p9, %p1141_p11  ;;  %p1235_p0 = scmp.ne.s32.totalorder %s173_s7, %s1234_s8 }
  0x12   : > { %p1243_p4 = scmp.lt.s32.totalorder %s1234_s8, %s1234_s8 }
  0x13   : > { %p1225_p13 = pneg %p1142_p12 }
  0x14   : > { %p1244_p6 = por %p1243_p4, %p1242_p3 }
  0x15   : > { %p1237_p1 = pnand %p1235_p0, %p1225_p13 }
  0x17   : > { %p1238_p2 = pneg %p1237_p1 }
  0x19   : > { %p1245_p7 = pnand %p1244_p6, %p1238_p2 }
  0x1b   : > { %1248 = shalt.err (!%p1245_p7)
}
  0x1c   : > { %s1316_s9 = smov 64   ;;  %s1317_s10 = smov 4  }
  0x1d   : > { %1144 = dma.hbm_to_vmem [thread:$0]  (!%p1142_p12), %s1673_s1, 128, %s173_s7, [#allocation4], %s1316_s9, %s1316_s9, %s1317_s10  }
  0x1e   : > { %205 = sbr.rel (%p1414_p10) target bundleno = 1141 (0x475), region = 40 }
  0x23   : > { %1292 = dma.done.wait (%p1149_p9), [#allocation4], 128  }
  0x24   : > { %1294 = vsyncadd (%p1149_p9), [#allocation4], 4294967168  ;;  %v1318_v0 = vmov 3   ;;  %v1319_v1 = vmov 4   ;;  %p233_p6 = scmp.lt.s32.totalorder %s1386_s22, 1  ;;  %v1320_v2 = vmov 0.0   ;;  %v242_v12 = vlaneseq }
  0x25   : > { %1203 = vset.pattern.permute.xlu0 %v1318_v0  ;;  %1205 = vset.pattern.permute.xlu1 %v1319_v1  ;;  %238 = vst [vmem:[#allocation2] sm:$0xff] %v1320_v2  ;;  %239 = vst [vmem:[#allocation2 + $0x8] sm:$0xff] %v1320_v2  ;;  %v285_v3 = vld [vmem:[#allocation3] sm:$0xf]  ;;  %v1321_v5 = vmov 6   ;;  %v1322_v6 = vmov 5  }
  0x26   : > { %s234_s13 = scalar_select %p233_p6, %s1386_s22, 1  ;;  %644 = vmatprep.mubr.f32.mxu0 %v1320_v2  ;;  %1011 = vmatprep.mubr.f32.mxu1 %v1320_v2  ;;  %v1323_v7 = vmov 7   ;;  %v1324_v8 = vmov 8   ;;  %v1325_v9 = vmov 0   ;;  %v1326_v10 = vmov 2  }
  0x27   : > { %311 = vperm.xlu0 %1203, %v285_v3   ;;  %405 = vperm.xlu1 %1205, %v285_v3   ;;  %v1327_v11 = vmov 1   ;;  %v1328_v13 = vmov 839922192   ;;  %v302_v16 = vshrl.u32 %v242_v12, 7  ;;  %s1329_s23 = smov 112   ;;  %s1330_s25 = smov 96  }
  0x28   : > { %s1133_s14 = sshll.u32 %s234_s13, 3  ;;  %v299_v14 = vunpack.c.l.s4 %v1328_v13  ;;  %v286_v46 = vld [vmem:[%s1674_s2] sm:$0xf]  ;;  %vm331_vm0 = vcmask 1043456   ;;  %vm361_vm1 = vcmask 785408   ;;  %vm333_vm2 = vcmask 916480  }
  0x29   : > { %s237_s17 = scalar_lea.vmem %s1672_s0, %s1133_s14  ;;  %s1331_s6 = smov 17   ;;  %vm377_vm3 = vcmask 138240   ;;  %vm462_vm6 = vcmask 130048   ;;  %vm549_vm7 = vcmask 121856   ;;  %vm572_vm10 = vcmask 31744  }
  0x2a   : > { %v1437_v4 = vld [vmem:[%s237_s17] sm:$0xff]  ;;  %v300_v15 = vunpack.c.0.s8 %v299_v14  ;;  %s1332_s7 = smov 15   ;;  %s1333_s8 = smov 16  }
  0x2b   : > { %241 = vst [vmem:[#allocation2 + $0x4] sm:$0xff] %v1437_v4  ;;  %1204 = vset.pattern.permute.xlu0 %v1321_v5  ;;  %1206 = vset.pattern.permute.xlu1 %v1322_v6  ;;  %s1134_s30 = sshll.u32 %s1386_s22, 7  ;;  %s1334_s13 = smov [#allocation6]  }
  0x2c   : > { %342 = vperm.xlu0 %1204, %v285_v3   ;;  %489 = vperm.xlu1 %1206, %v285_v3   ;;  %v1449_v17 = vsub.s32 %v300_v15, %v302_v16  ;;  %v340_v36 = vld [vmem:[#allocation2 + $0xc] sm:$0xf]  ;;  %s1037_s10 = scalar_lea.hbm %s1677_s5, %s1134_s30  ;;  %s1253_s14 = sshll.u32 %s1334_s13, 4  ;;  %s1254_s14 = int_to_ptr.vmem [resolvable:$false] %s1253_s14 }
  0x2d   : > { %v487_v40 = vld [vmem:[#allocation2 + $0xc] sm:$0xf]  ;;  %s1255_s22 = scalar_lea.vmem %s1254_s14, 256 }
  0x2e   : > { %v426_v43 = vld [vmem:[#allocation2 + $0xc] sm:$0xf] }
  0x30   : > { %1207 = vset.pattern.permute.xlu1 %v1323_v7  ;;  %1208 = vset.pattern.permute.xlu0 %v1324_v8 }
  0x31   : > { %428 = vperm.xlu1 %1207, %v285_v3   ;;  %515 = vperm.xlu0 %1208, %v285_v3  }
  0x32   : > { %v1451_v19 = vld [vmem:[#allocation2] sm:$0xff]  ;;  %v293_v23 = vld [vmem:[#allocation2 + $0x8] sm:$0xf] }
  0x33   : > { %v387_v14 = vld [vmem:[#allocation2 + $0x8] sm:$0xf] }
  0x35   : > { %1209 = vset.pattern.permute.xlu1 %v1325_v9  ;;  %1211 = vset.pattern.permute.xlu0 %v1326_v10 }
  0x36   : > { %296 = vperm.xlu1 %1209, %v285_v3   ;;  %472 = vperm.xlu0 %1211, %v285_v3  }
  0x3a   : > { %1210 = vset.pattern.permute.xlu1 %v1327_v11  ;;  %1213 = vset.pattern.permute.xlu0 %v1318_v0 }
  0x3b   : > { %389 = vperm.xlu1 %1210, %v285_v3  }
  0x3f   : > { %1212 = vset.pattern.permute.xlu1 %v1325_v9 }
  0xa2   : > { %v312_v18 = vpop.permute.xlu0 %311  ;;  %v406_v20 = vpop.permute.xlu1 %405 }
  0xa3   : > { %v319_v21 = vrot.slane %v312_v18, %v1449_v17  ;;  %v413_v28 = vrot.slane %v406_v20, %v1449_v17 }
  0xa5   : > { %v321_v22 = vmul.f32 %v319_v21, %v1451_v19  ;;  %v322_v27 = vmul.f32 %v319_v21, %v293_v23  ;;  %v415_v33 = vmul.f32 %v413_v28, %v1437_v4 }
  0xa7   : > { %v343_v24 = vpop.permute.xlu0 %342  ;;  %325 = vrot.lane.b32.xlu1 %v321_v22, %s1329_s23  ;;  %v490_v25 = vpop.permute.xlu1 %489 }
  0xa8   : > { %v350_v26 = vrot.slane %v343_v24, %v1449_v17  ;;  %v497_v30 = vrot.slane %v490_v25, %v1449_v17 }
  0xaa   : > { %v352_v29 = vmul.f32 %v350_v26, %v1437_v4  ;;  %v499_v35 = vmul.f32 %v497_v30, %v1437_v4  ;;  %v353_v39 = vmul.f32 %v350_v26, %v340_v36  ;;  %v500_v42 = vmul.f32 %v497_v30, %v487_v40 }
  0xab   : > { %327 = vrot.lane.b32.xlu1 %v322_v27, %s1329_s23 }
  0xac   : > { %356 = vrot.lane.b32.xlu0 %v352_v29, %s1330_s25  ;;  %v429_v31 = vpop.permute.xlu1 %428  ;;  %v516_v32 = vpop.permute.xlu0 %515 }
  0xad   : > { %v436_v34 = vrot.slane %v429_v31, %v1449_v17  ;;  %v523_v38 = vrot.slane %v516_v32, %v1449_v17 }
  0xaf   : > { %v438_v37 = vmul.f32 %v436_v34, %v1437_v4  ;;  %417 = vrot.lane.b32.xlu1 %v415_v33, %s1329_s23  ;;  %v525_v41 = vmul.f32 %v523_v38, %v1437_v4  ;;  %v439_v44 = vmul.f32 %v436_v34, %v426_v43  ;;  %v526_v45 = vmul.f32 %v523_v38, %v487_v40 }
  0xb0   : > { %503 = vrot.lane.b32.xlu0 %v499_v35, %s1329_s23 }
  0xb1   : > { %v297_v47 = vpop.permute.xlu1 %296  ;;  %v473_v49 = vpop.permute.xlu0 %472 }
  0xb2   : > { %v304_v53 = vrot.slane %v297_v47, %v1449_v17  ;;  %v480_v60 = vrot.slane %v473_v49, %v1449_v17 }
  0xb3   : > { %442 = vrot.lane.b32.xlu1 %v438_v37, %s1330_s25 }
  0xb4   : > { %358 = vrot.lane.b32.xlu0 %v353_v39, %s1330_s25  ;;  %v307_v57 = vmul.f32 %v304_v53, %v293_v23  ;;  %v482_v20 = vmul.f32 %v480_v60, %v1451_v19  ;;  %v306_v25 = vmul.f32 %v304_v53, %v1451_v19  ;;  %v659_v53 = vld [vmem:[#allocation3 + $0x4] sm:$0xf] }
  0xb6   : > { %v390_v48 = vpop.permute.xlu1 %389 }
  0xb7   : > { %529 = vrot.lane.b32.xlu1 %v525_v41, %s1330_s25  ;;  %v397_v2 = vrot.slane %v390_v48, %v1449_v17 }
  0xb8   : > { %505 = vrot.lane.b32.xlu0 %v500_v42, %s1329_s23 }
  0xb9   : > { %v400_v26 = vmul.f32 %v397_v2, %v387_v14  ;;  %v399_v30 = vmul.f32 %v397_v2, %v1451_v19  ;;  %v470_v19 = vld [vmem:[#allocation2 + $0x8] sm:$0xf] }
  0xbb   : > { %444 = vrot.lane.b32.xlu1 %v439_v44, %s1330_s25 }
  0xbc   : > { %531 = vrot.lane.b32.xlu0 %v526_v45, %s1330_s25  ;;  %v483_v45 = vmul.f32 %v480_v60, %v470_v19 }
  0xbf   : > { %289 = vperm.xlu1 %1212, %v286_v46  }
 0x119   : > { %v326_v50 = vpop.permute.xlu1 %325 }
 0x11a   : > { %v329_v59 = vrot.slane %v326_v50, 4 }
 0x11d   : > { %v328_v51 = vpop.permute.xlu1 %327 }
 0x11e   : > { %v357_v52 = vpop.permute.xlu0 %356  ;;  %v330_v56 = vrot.slane %v328_v51, 4  ;;  %v338_v63 = vadd.f32 %v328_v51, %v307_v57 }
 0x11f   : > { %v360_v61 = vrot.slane %v357_v52, 4 }
 0x120   : > { %v332_v3 = vsel %vm331_vm0, %v329_v59, %v330_v56 }
 0x121   : > { %v418_v54 = vpop.permute.xlu1 %417  ;;  %v334_v22 = vsel %vm333_vm2, %v326_v50, %v332_v3  ;;  %v362_v36 = vsel %vm361_vm1, %v360_v61, %v357_v52  ;;  %v564_v52 = vld [vmem:[%s1676_s4] sm:$0xf] }
 0x122   : > { %v504_v55 = vpop.permute.xlu0 %503  ;;  %v419_v15 = vrot.slane %v418_v54, 4  ;;  %v337_v31 = vadd.f32 %v334_v22, %v306_v25 }
 0x123   : > { %v507_v58 = vrot.slane %v504_v55, 4 }
 0x124   : > { %v420_v28 = vsel %vm333_vm2, %v419_v15, %v418_v54  ;;  %v424_v32 = vadd.f32 %v419_v15, %v400_v26  ;;  %v366_v41 = vadd.f32 %v362_v36, %v337_v31 }
 0x125   : > { %v443_v62 = vpop.permute.xlu1 %442  ;;  %v508_v16 = vsel %vm333_vm2, %v507_v58, %v504_v55  ;;  %v423_v39 = vadd.f32 %v420_v28, %v399_v30  ;;  %v563_v30 = vld [vmem:[%s1675_s3] sm:$0xf] }
 0x126   : > { %v359_v0 = vpop.permute.xlu0 %358  ;;  %v446_v23 = vrot.slane %v443_v62, 4  ;;  %v512_v27 = vadd.f32 %v508_v16, %v482_v20  ;;  %v370_v49 = vcombine.high %v366_v41, %v366_v41 }
 0x127   : > { %v363_v13 = vsel %vm361_vm1, %v360_v61, %v359_v0 }
 0x128   : > { %v367_v18 = vadd.f32 %v363_v13, %v338_v63  ;;  %v447_v37 = vsel %vm361_vm1, %v446_v23, %v443_v62 }
 0x129   : > { %v530_v21 = vpop.permute.xlu1 %529  ;;  %v451_v42 = vadd.f32 %v447_v37, %v423_v39 }
 0x12a   : > { %v533_v24 = vrot.slane %v530_v21, 4  ;;  %375 = vrot.lane.b32.xlu0 %v367_v18, %s1331_s6  ;;  %v506_v34 = vpop.permute.xlu0 %505 }
 0x12b   : > { %v509_v44 = vsel %vm333_vm2, %v507_v58, %v506_v34  ;;  %v455_v46 = vcombine.high %v451_v42, %v451_v42 }
 0x12c   : > { %v534_v29 = vsel %vm361_vm1, %v533_v24, %v530_v21  ;;  %v513_v48 = vadd.f32 %v509_v44, %v483_v45 }
 0x12d   : > { %v538_v33 = vadd.f32 %v534_v29, %v512_v27  ;;  %v445_v35 = vpop.permute.xlu1 %444 }
 0x12e   : > { %v448_v38 = vsel %vm361_vm1, %v446_v23, %v445_v35  ;;  %v532_v43 = vpop.permute.xlu0 %531 }
 0x12f   : > { %v452_v40 = vadd.f32 %v448_v38, %v424_v32  ;;  %543 = vrot.lane.b32.xlu0 %v538_v33, %s1332_s7  ;;  %v535_v47 = vsel %vm361_vm1, %v533_v24, %v532_v43  ;;  %v542_v51 = vcombine.high %v538_v33, %v538_v33  ;;  %v713_v32 = vld [vmem:[#allocation2 + $0xc] sm:$0xf] }
 0x130   : > { %v539_v50 = vadd.f32 %v535_v47, %v513_v48 }
 0x131   : > { %460 = vrot.lane.b32.xlu1 %v452_v40, %s1333_s8 }
 0x133   : > { %371 = vrot.lane.b32.xlu0 %v366_v41, %s1331_s6 }
 0x135   : > { %456 = vrot.lane.b32.xlu1 %v451_v42, %s1333_s8 }
 0x137   : > { %458 = vrot.lane.b32.xlu0 %v455_v46, %s1333_s8 }
 0x139   : > { %373 = vrot.lane.b32.xlu1 %v370_v49, %s1331_s6 }
 0x13a   : > { %v290_v54 = vpop.permute.xlu1 %289 }
 0x13b   : > { %547 = vrot.lane.b32.xlu0 %v539_v50, %s1332_s7 }
 0x13d   : > { %545 = vrot.lane.b32.xlu1 %v542_v51, %s1332_s7 }
 0x13f   : > { %686 = vperm.xlu0 %1213, %v659_v53  }
 0x141   : > { %567 = vperm.xlu1 %1212, %v564_v52  }
 0x143   : > { %1216 = vset.pattern.permute.xlu0 %v1322_v6 }
 0x144   : > { %859 = vperm.xlu0 %1216, %v659_v53  }
 0x145   : > { %1214 = vset.pattern.permute.xlu1 %v1321_v5  ;;  %v243_v5 = vand.u32 127, %v242_v12 }
 0x146   : > { %715 = vperm.xlu1 %1214, %v659_v53  }
 0x147   : > { %v249_v56 = vand.u32 15, %v243_v5 }
 0x148   : > { %1219 = vset.pattern.permute.xlu0 %v1325_v9 }
 0x149   : > { %671 = vperm.xlu0 %1219, %v659_v53  }
 0x14a   : > { %1215 = vset.pattern.permute.xlu1 %v1319_v1  ;;  %v244_v1 = vadd.s32 128, %v243_v5 }
 0x14b   : > { %776 = vperm.xlu1 %1215, %v659_v53  }
 0x14f   : > { %1217 = vset.pattern.permute.xlu1 %v1323_v7  ;;  %v256_v7 = vand.u32 15, %v244_v1  ;;  %v857_v1 = vld [vmem:[#allocation2 + $0xc] sm:$0xf] }
 0x150   : > { %799 = vperm.xlu1 %1217, %v659_v53  }
 0x151   : > { %v1520_v59 = vadd.s32 4294967295, %v256_v7 }
 0x153   : > { %vm272_vm5 = vcmp.ge.s32.totalorder %v1520_v59, 0 }
 0x154   : > { %1218 = vset.pattern.permute.xlu1 %v1324_v8  ;;  %v1518_v8 = vadd.s32 4294967295, %v249_v56 }
 0x155   : > { %885 = vperm.xlu1 %1218, %v659_v53  }
 0x156   : > { %vm271_vm4 = vcmp.ge.s32.totalorder %v1518_v8, 0 }
 0x159   : > { %1220 = vset.pattern.permute.xlu1 %v1327_v11 }
 0x15a   : > { %760 = vperm.xlu1 %1220, %v659_v53  }
 0x15e   : > { %1221 = vset.pattern.permute.xlu1 %v1326_v10  ;;  %v1526_v10 = vadd.s32 1, %v256_v7 }
 0x15f   : > { %842 = vperm.xlu1 %1221, %v659_v53  }
 0x160   : > { %vm282_vm9 = vcmp.lt.s32.totalorder %v1526_v10, 16 }
 0x163   : > { %1222 = vset.pattern.permute.xlu1 %v1325_v9  ;;  %v1524_v9 = vadd.s32 1, %v249_v56 }
 0x165   : > { %vm281_vm8 = vcmp.lt.s32.totalorder %v1524_v9, 16 }
 0x19c   : > { %v376_v6 = vpop.permute.xlu0 %375 }
 0x1a1   : > { %v544_v55 = vpop.permute.xlu0 %543 }
 0x1a3   : > { %v461_v57 = vpop.permute.xlu1 %460 }
 0x1a5   : > { %v372_v58 = vpop.permute.xlu0 %371 }
 0x1a7   : > { %v457_v11 = vpop.permute.xlu1 %456 }
 0x1a9   : > { %v459_v60 = vpop.permute.xlu0 %458 }
 0x1aa   : > { %v463_v13 = vsel %vm462_vm6, %v457_v11, %v459_v60  ;;  %v464_v14 = vsel %vm462_vm6, %v459_v60, %v461_v57  ;;  %v797_v11 = vld [vmem:[#allocation2 + $0xc] sm:$0xf] }
 0x1ab   : > { %v374_v12 = vpop.permute.xlu1 %373 }
 0x1ac   : > { %v378_v61 = vsel %vm377_vm3, %v372_v58, %v374_v12  ;;  %v379_v62 = vsel %vm377_vm3, %v374_v12, %v376_v6 }
 0x1ad   : > { %v382_v63 = vsel %vm271_vm4, %v378_v61, 0.0  ;;  %v383_v0 = vsel %vm272_vm5, %v379_v62, 0.0  ;;  %v548_v15 = vpop.permute.xlu0 %547  ;;  %v1122_v61 = vld [vmem:[%s1674_s2 + $0x4] sm:$0xf] }
 0x1ae   : > { %v384_v2 = vadd.f32 %v382_v63, %v290_v54  ;;  %v385_v3 = vadd.f32 %v383_v0, %v290_v54 }
 0x1af   : > { %v546_v16 = vpop.permute.xlu1 %545 }
 0x1b0   : > { %v467_v18 = vadd.f32 %v463_v13, %v384_v2  ;;  %v468_v20 = vadd.f32 %v464_v14, %v385_v3  ;;  %v550_v21 = vsel %vm549_vm7, %v544_v55, %v546_v16  ;;  %v551_v22 = vsel %vm549_vm7, %v546_v16, %v548_v15 }
 0x1b1   : > { %v554_v23 = vsel %vm281_vm8, %v550_v21, 0.0  ;;  %v555_v24 = vsel %vm282_vm9, %v551_v22, 0.0 }
 0x1b2   : > { %v556_v25 = vadd.f32 %v554_v23, %v467_v18  ;;  %v557_v26 = vadd.f32 %v555_v24, %v468_v20 }
 0x1b4   : > { %v560_v27 = vcombine.low %v556_v25, %v557_v26 }
 0x1b6   : > { %v562_v28 = vadd.f32 %v560_v27, %v1437_v4 }
 0x1b8   : > { %v571_v29 = vcombine.high %v562_v28, %v562_v28 }
 0x1ba   : > { %1119 = vmatprep.subr.msk.mxu0 %vm331_vm0, %v571_v29  ;;  %v687_v43 = vpop.permute.xlu0 %686 }
 0x1bb   : > { %1120 = vmatpush1.msk.msra.mxu0 %vm331_vm0, %v562_v28  ;;  %v694_v44 = vrot.slane %v687_v43, %v1449_v17 }
 0x1bc   : > { %1121 = vmatmul.mubr.msk.f32.vlgmr.msra.gmra.mxu0 %vm572_vm10, %v563_v30  ;;  %v568_v31 = vpop.permute.xlu1 %567 }
 0x1bf   : > { %v860_v51 = vpop.permute.xlu0 %859 }
 0x1c0   : > { %v867_v53 = vrot.slane %v860_v51, %v1449_v17 }
 0x1c1   : > { %v716_v33 = vpop.permute.xlu1 %715 }
 0x1c2   : > { %v723_v34 = vrot.slane %v716_v33, %v1449_v17  ;;  %v870_v57 = vmul.f32 %v867_v53, %v857_v1 }
 0x1c4   : > { %v726_v35 = vmul.f32 %v723_v34, %v713_v32  ;;  %v672_v63 = vpop.permute.xlu0 %671 }
 0x1c5   : > { %v679_v3 = vrot.slane %v672_v63, %v1449_v17 }
 0x1c6   : > { %731 = vrot.lane.b32.xlu0 %v726_v35, %s1330_s25  ;;  %v777_v19 = vpop.permute.xlu1 %776 }
 0x1c7   : > { %v784_v48 = vrot.slane %v777_v19, %v1449_v17 }
 0x1cb   : > { %v800_v45 = vpop.permute.xlu1 %799 }
 0x1cc   : > { %v807_v52 = vrot.slane %v800_v45, %v1449_v17 }
 0x1ce   : > { %v810_v60 = vmul.f32 %v807_v52, %v797_v11 }
 0x1d0   : > { %v886_v54 = vpop.permute.xlu1 %885 }
 0x1d1   : > { %v893_v56 = vrot.slane %v886_v54, %v1449_v17 }
 0x1d3   : > { %v896_v12 = vmul.f32 %v893_v56, %v857_v1 }
 0x1d5   : > { %v761_v62 = vpop.permute.xlu1 %760 }
 0x1d6   : > { %v768_v15 = vrot.slane %v761_v62, %v1449_v17  ;;  %v1124_v62 = vld [vmem:[%s1676_s4 + $0x4] sm:$0xf] }
 0x1da   : > { %v843_v2 = vpop.permute.xlu1 %842 }
 0x238   : > { %v732_v0 = vpop.permute.xlu0 %731 }
 0x27c   : > { %v646_v36 = vpop.f32.mrf.mxu0 }
 0x27d   : > { %v1553_v37 = vadd.f32 %v646_v36, %v568_v31  ;;  %v850_v36 = vrot.slane %v843_v2, %v1449_v17 }
 0x27e   : > { %v648_v38 = vpop.f32.mrf.mxu0 }
 0x27f   : > { %v1555_v39 = vadd.f32 %v648_v38, %v568_v31  ;;  %v651_v40 = vmax.f32 %v1553_v37, 0.0 }
 0x281   : > { %v652_v41 = vmax.f32 %v1555_v39, 0.0 }
 0x283   : > { %v655_v42 = vcombine.low %v651_v40, %v652_v41 }
 0x285   : > { %657 = vst [vmem:[#allocation2 + $0x4] sm:$0xff] %v655_v42  ;;  %v725_v5 = vmul.f32 %v723_v34, %v655_v42  ;;  %v786_v6 = vmul.f32 %v784_v48, %v655_v42  ;;  %v809_v55 = vmul.f32 %v807_v52, %v655_v42  ;;  %v869_v7 = vmul.f32 %v867_v53, %v655_v42 }
 0x286   : > { %v895_v58 = vmul.f32 %v893_v56, %v655_v42 }
 0x28c   : > { %v1564_v46 = vld [vmem:[#allocation2] sm:$0xff]  ;;  %v668_v47 = vld [vmem:[#allocation2 + $0x8] sm:$0xf] }
 0x28d   : > { %v696_v49 = vmul.f32 %v694_v44, %v1564_v46  ;;  %v697_v50 = vmul.f32 %v694_v44, %v668_v47  ;;  %v682_v16 = vmul.f32 %v679_v3, %v668_v47  ;;  %v770_v26 = vmul.f32 %v768_v15, %v1564_v46  ;;  %v758_v34 = vld [vmem:[#allocation2 + $0x8] sm:$0xf] }
 0x28e   : > { %v840_v44 = vld [vmem:[#allocation2 + $0x8] sm:$0xf]  ;;  %v771_v47 = vmul.f32 %v768_v15, %v758_v34  ;;  %v681_v51 = vmul.f32 %v679_v3, %v1564_v46 }
 0x28f   : > { %702 = vrot.lane.b32.xlu1 %v697_v50, %s1329_s23  ;;  %700 = vrot.lane.b32.xlu0 %v696_v49, %s1329_s23  ;;  %v853_v52 = vmul.f32 %v850_v36, %v840_v44 }
 0x293   : > { %729 = vrot.lane.b32.xlu0 %v725_v5, %s1330_s25  ;;  %788 = vrot.lane.b32.xlu1 %v786_v6, %s1329_s23 }
 0x297   : > { %873 = vrot.lane.b32.xlu0 %v869_v7, %s1329_s23  ;;  %813 = vrot.lane.b32.xlu1 %v809_v55, %s1330_s25 }
 0x29b   : > { %875 = vrot.lane.b32.xlu0 %v870_v57, %s1329_s23  ;;  %899 = vrot.lane.b32.xlu1 %v895_v58, %s1330_s25 }
 0x29f   : > { %901 = vrot.lane.b32.xlu0 %v896_v12, %s1330_s25  ;;  %815 = vrot.lane.b32.xlu1 %v810_v60, %s1330_s25  ;;  %v852_v60 = vmul.f32 %v850_v36, %v1564_v46  ;;  %s230_s25 = sand.u32 1, %s1305_s19  }
 0x2a0   : > { %s1116_s26 = sshll.u32 %s230_s25, 3  ;;  %s1025_s11 = scalar_lea.sflag [#allocation5], %s230_s25 }
 0x2a3   : > { %664 = vperm.xlu1 %1222, %v1122_v61  }
 0x301   : > { %v701_v13 = vpop.permute.xlu0 %700  ;;  %v703_v14 = vpop.permute.xlu1 %702 }
 0x302   : > { %v711_v23 = vadd.f32 %v703_v14, %v682_v16  ;;  %v704_v27 = vrot.slane %v701_v13, 4  ;;  %v705_v28 = vrot.slane %v703_v14, 4 }
 0x304   : > { %v706_v38 = vsel %vm331_vm0, %v704_v27, %v705_v28 }
 0x305   : > { %v730_v18 = vpop.permute.xlu0 %729  ;;  %v789_v20 = vpop.permute.xlu1 %788  ;;  %v707_v48 = vsel %vm333_vm2, %v701_v13, %v706_v38 }
 0x306   : > { %v733_v21 = vrot.slane %v730_v18, 4  ;;  %v790_v22 = vrot.slane %v789_v20, 4  ;;  %v710_v55 = vadd.f32 %v707_v48, %v681_v51 }
 0x308   : > { %v791_v24 = vsel %vm333_vm2, %v790_v22, %v789_v20  ;;  %v735_v25 = vsel %vm361_vm1, %v733_v21, %v732_v0  ;;  %v795_v53 = vadd.f32 %v790_v22, %v771_v47  ;;  %v734_v57 = vsel %vm361_vm1, %v733_v21, %v730_v18 }
 0x309   : > { %v874_v29 = vpop.permute.xlu0 %873  ;;  %v814_v30 = vpop.permute.xlu1 %813  ;;  %v739_v31 = vadd.f32 %v735_v25, %v711_v23  ;;  %v794_v33 = vadd.f32 %v791_v24, %v770_v26  ;;  %v738_v12 = vadd.f32 %v734_v57, %v710_v55 }
 0x30a   : > { %v817_v32 = vrot.slane %v814_v30, 4  ;;  %v877_v45 = vrot.slane %v874_v29, 4 }
 0x30b   : > { %747 = vrot.lane.b32.xlu1 %v739_v31, %s1331_s6  ;;  %v742_v2 = vcombine.high %v738_v12, %v738_v12 }
 0x30c   : > { %v818_v35 = vsel %vm361_vm1, %v817_v32, %v814_v30  ;;  %v878_v11 = vsel %vm333_vm2, %v877_v45, %v874_v29 }
 0x30d   : > { %v822_v42 = vadd.f32 %v818_v35, %v794_v33  ;;  %v876_v19 = vpop.permute.xlu0 %875  ;;  %v900_v43 = vpop.permute.xlu1 %899  ;;  %v882_v63 = vadd.f32 %v878_v11, %v852_v60 }
 0x30e   : > { %v879_v49 = vsel %vm333_vm2, %v877_v45, %v876_v19  ;;  %v903_v50 = vrot.slane %v900_v43, 4  ;;  %v1123_v19 = vld [vmem:[%s1675_s3 + $0x4] sm:$0xf] }
 0x30f   : > { %827 = vrot.lane.b32.xlu1 %v822_v42, %s1333_s8  ;;  %v826_v6 = vcombine.high %v822_v42, %v822_v42  ;;  %v883_v56 = vadd.f32 %v879_v49, %v853_v52 }
 0x310   : > { %v904_v61 = vsel %vm361_vm1, %v903_v50, %v900_v43 }
 0x311   : > { %v902_v17 = vpop.permute.xlu0 %901  ;;  %v816_v5 = vpop.permute.xlu1 %815  ;;  %v908_v0 = vadd.f32 %v904_v61, %v882_v63 }
 0x312   : > { %v905_v54 = vsel %vm361_vm1, %v903_v50, %v902_v17  ;;  %v819_v1 = vsel %vm361_vm1, %v817_v32, %v816_v5 }
 0x313   : > { %v823_v7 = vadd.f32 %v819_v1, %v795_v53  ;;  %829 = vrot.lane.b32.xlu1 %v826_v6, %s1333_s8  ;;  %v909_v58 = vadd.f32 %v905_v54, %v883_v56  ;;  %v912_v3 = vcombine.high %v908_v0, %v908_v0 }
 0x315   : > { %831 = vrot.lane.b32.xlu0 %v823_v7, %s1333_s8 }
 0x317   : > { %917 = vrot.lane.b32.xlu1 %v909_v58, %s1332_s7 }
 0x319   : > { %743 = vrot.lane.b32.xlu0 %v738_v12, %s1331_s6 }
 0x31b   : > { %935 = vperm.xlu1 %1222, %v1124_v62  }
 0x31d   : > { %745 = vrot.lane.b32.xlu0 %v742_v2, %s1331_s6  ;;  %s232_s6 = scalar_lea.vmem [#allocation6], %s1116_s26 }
 0x31e   : > { %v665_v46 = vpop.permute.xlu1 %664 }
 0x321   : > { %915 = vrot.lane.b32.xlu0 %v912_v3, %s1332_s7 }
 0x325   : > { %913 = vrot.lane.b32.xlu0 %v908_v0, %s1332_s7  ;;  %s1039_s7 = sshll.u32 %s232_s6, 4  ;;  %s1040_s7 = int_to_ptr.vmem [resolvable:$true] %s1039_s7 }
 0x326   : > { %s1249_s12 = scalar_lea.vmem %s1040_s7, 128  ;;  %p1256_p11 = scmp.lt.s32.totalorder %s1040_s7, %s1254_s14 }
 0x327   : > { %p1250_p8 = scmp.ne.s32.totalorder %s1040_s7, %s1249_s12  ;;  %p1257_p12 = scmp.lt.s32.totalorder %s1255_s22, %s1249_s12 }
 0x329   : > { %p1251_p9 = pnand %p1250_p8, %p1403_p5  ;;  %p1258_p13 = por %p1257_p12, %p1256_p11 }
 0x32b   : > { %p1252_p10 = pneg %p1251_p9 }
 0x32d   : > { %p1259_p0 = pnand %p1258_p13, %p1252_p10 }
 0x37d   : > { %v748_v13 = vpop.permute.xlu1 %747 }
 0x381   : > { %v828_v14 = vpop.permute.xlu1 %827 }
 0x385   : > { %v830_v18 = vpop.permute.xlu1 %829 }
 0x386   : > { %v833_v8 = vsel %vm462_vm6, %v828_v14, %v830_v18 }
 0x387   : > { %v832_v15 = vpop.permute.xlu0 %831 }
 0x388   : > { %v834_v26 = vsel %vm462_vm6, %v830_v18, %v832_v15 }
 0x389   : > { %v918_v27 = vpop.permute.xlu1 %917 }
 0x38b   : > { %v744_v16 = vpop.permute.xlu0 %743 }
 0x38f   : > { %v746_v20 = vpop.permute.xlu0 %745 }
 0x390   : > { %v749_v21 = vsel %vm377_vm3, %v744_v16, %v746_v20  ;;  %v750_v22 = vsel %vm377_vm3, %v746_v20, %v748_v13 }
 0x391   : > { %v753_v23 = vsel %vm271_vm4, %v749_v21, 0.0  ;;  %v754_v24 = vsel %vm272_vm5, %v750_v22, 0.0 }
 0x392   : > { %v756_v25 = vadd.f32 %v754_v24, %v665_v46  ;;  %v755_v29 = vadd.f32 %v753_v23, %v665_v46 }
 0x393   : > { %v916_v28 = vpop.permute.xlu0 %915 }
 0x394   : > { %v920_v30 = vsel %vm549_vm7, %v916_v28, %v918_v27  ;;  %v838_v31 = vadd.f32 %v834_v26, %v756_v25  ;;  %v837_v35 = vadd.f32 %v833_v8, %v755_v29 }
 0x395   : > { %v924_v32 = vsel %vm282_vm9, %v920_v30, 0.0 }
 0x396   : > { %v926_v33 = vadd.f32 %v924_v32, %v838_v31  ;;  %v936_v9 = vpop.permute.xlu1 %935 }
 0x397   : > { %v914_v34 = vpop.permute.xlu0 %913 }
 0x398   : > { %v919_v59 = vsel %vm549_vm7, %v914_v34, %v916_v28  ;;  %v928_v36 = vadd.f32 %v926_v33, %v652_v41 }
 0x399   : > { %v923_v38 = vsel %vm281_vm8, %v919_v59, 0.0 }
 0x39a   : > { %v925_v42 = vadd.f32 %v923_v38, %v837_v35  ;;  %1125 = vmatprep.subr.msk.mxu1 %vm331_vm0, %v928_v36 }
 0x39c   : > { %v927_v10 = vadd.f32 %v925_v42, %v651_v40 }
 0x39e   : > { %1126 = vmatpush1.msk.msra.mxu1 %vm331_vm0, %v927_v10 }
 0x39f   : > { %1127 = vmatmul.mubr.msk.f32.vlgmr.msra.gmra.mxu1 %vm572_vm10, %v1123_v19 }
 0x45f   : > { %v1013_v39 = vpop.f32.mrf.mxu1 }
 0x460   : > { %v1014_v43 = vadd.f32 %v1013_v39, %v936_v9 }
 0x461   : > { %v1015_v41 = vpop.f32.mrf.mxu1 }
 0x462   : > { %v1016_v44 = vadd.f32 %v1015_v41, %v936_v9 }
 0x464   : > { %v1020_v37 = vcombine.low %v1014_v43, %v1016_v44 }
 0x466   : > { %v1022_v40 = vadd.f32 %v1020_v37, %v1437_v4 }
 0x468   : > { %1023 = vst [vmem:[%s232_s6] sm:$0xff] %v1022_v40 }
 0x469   : > { %1262 = shalt.err (!%p1259_p0)
}
 0x46a   : > { %s1263_s15 = scalar_lea.hbm %s1037_s10, 128  ;;  %s1267_s23 = scalar_lea.hbm %s1677_s5, 256 }
 0x46b   : > { %p1264_p1 = scmp.ne.s32.totalorder %s1037_s10, %s1263_s15  ;;  %p1268_p4 = scmp.lt.s32.totalorder %s1037_s10, %s1677_s5 }
 0x46c   : > { %p1269_p7 = scmp.lt.s32.totalorder %s1267_s23, %s1263_s15 }
 0x46d   : > { %p1265_p2 = pnand %p1264_p1, %p1403_p5 }
 0x46e   : > { %p1270_p6 = por %p1269_p7, %p1268_p4 }
 0x46f   : > { %p1266_p3 = pneg %p1265_p2 }
 0x471   : > { %p1271_p8 = pnand %p1270_p6, %p1266_p3 }
 0x473   : > { %1274 = shalt.err (!%p1271_p8)
}
 0x474   : > { %1139 = dma.vmem_to_hbm [thread:$0]  (%p1403_p5), %s1040_s7, 128, %s1037_s10, %s1025_s11  }
 0x475 PF: > { %p1151_p9 = scmp.ge.s32.totalorder %s1313_s21, 2  ;;  %s1051_s30 = sand.u32 1, %s1301_s18  }
 0x476   : > { %p1681_p10 = scmp.ne.s32.totalorder %s1679_s29, 0  ;;  %s1052_s6 = scalar_lea.sflag [#allocation5], %s1051_s30 }
 0x478   : > { %p1146_p11 = pnand %p1151_p9, %p1681_p10 }
 0x47a   : > { %p1147_p12 = pneg %p1146_p11 }
 0x47c   : > { %1296 = dma.done.wait (%p1147_p12), %s1052_s6, 128  }
 0x47d   : > { %1298 = vsyncadd (%p1147_p12), %s1052_s6, 4294967168  ;;  %p16_p13 = scmp.ge.s32.totalorder %s1390_s24, 4   ;;  %s1682_s18 = smov %s1305_s19 }
 0x47e   : > { %s1683_s19 = smov %s1309_s20  ;;  %s1684_s20 = smov %s1401_s27 }
 0x47f   : > { %s1685_s21 = smov %s1390_s24  ;;  %18 = sbr.rel (!%p16_p13) target bundleno = 4 (0x4), region = 84 }
 0x484   :  { %1057 = vsyncpa [#allocation4], 1 }
 0x485   :  { %1059 = vsyncpa [#allocation4 + $0x1], 1 }
 0x486   :  { %1060 = vsyncpa [#allocation5], 1 }
 0x487   :  { %1062 = vsyncpa [#allocation5 + $0x1], 1 }

</bundles_post_ra>
